<compile_context>
chip_gen: v5e
topology: v5e:2x2
jax: 0.10.0
libtpu: 0.0.40
codegen_flags: <defaults>
</compile_context>

<pallas_src>
import functools

import jax
import jax.numpy as jnp
from jax import lax
from jax.experimental import pallas as pl
from jax.experimental.pallas import tpu as pltpu

_LANES = 128
_NUM_CORES = 2                    # leading "parallel" axis (v7x: 2 TCs; harmless on 1-TC chips)
_TILE_BYTES = 1 << 20             # ~1 MiB per input per pipeline buffer on the streaming path
_ACC_ROWS = 64                    # small accumulator: 8 f32 vregs -> 8 independent VPU chains
_FUSED_MAX_F32_BYTES = 8 << 20    # gate (x+y as f32) for the single fused VMEM-resident kernel
_FUSED_VMEM_LIMIT = 48 << 20      # < 64 MiB physical on v7x; generous on v5e/v6e
_STREAM_VMEM_LIMIT = 40 << 20     # headroom above v5e's 16 MiB scoped default


# ---------------------------------------------------------------------------
# Fused single-call kernel (whole slab resident in VMEM).
# ---------------------------------------------------------------------------
def _berhu_fused_kernel(x_ref, y_ref, o_ref, *, delta_frac):
    err = x_ref[...].astype(jnp.float32) - y_ref[...].astype(jnp.float32)
    abserr = jnp.abs(err)
    # Lane-tail padding (wrapper) is zeros in both inputs -> err == 0 there,
    # contributing 0 to the max and 0 loss to the sum.
    delta = jnp.float32(delta_frac) * jnp.max(abserr)
    half_delta = jnp.float32(0.5) * delta
    half_inv_delta = jnp.where(delta > 0, jnp.float32(0.5) / delta, jnp.float32(0.0))
    # 0.5*(err^2 + delta^2)/delta == (0.5/delta)*err^2 + 0.5*delta  (no per-element divide)
    quad = (half_inv_delta * err) * err + half_delta
    losses = jnp.where(abserr <= delta, abserr, quad)
    o_ref[...] = jnp.zeros(o_ref.shape, jnp.float32) + jnp.sum(losses)


# ---------------------------------------------------------------------------
# Two-pass streaming kernels (large inputs).
# ---------------------------------------------------------------------------
def _fold_into_acc(acc_ref, tile, acc_rows, op):
    """Fold a (block_rows,128) tile into the small (acc_rows,128) accumulator.

    Pure VPU elementwise op per chunk; acc is loaded/stored once per grid step,
    so acc VMEM traffic is ~block_rows/acc_rows x lower than a tile-shaped acc.
    """
    acc = acc_ref[...]
    for j in range(tile.shape[0] // acc_rows):
        acc = op(acc, tile[j * acc_rows:(j + 1) * acc_rows, :])
    acc_ref[...] = acc


def _max_abserr_kernel(x_ref, y_ref, o_ref, acc_ref, *,
                       block_rows, acc_rows, rows, full_blocks):
    """Per-core max(|x - y|) partial, broadcast into this core's output block."""
    c = pl.program_id(0)
    i = pl.program_id(1)
    g = c * pl.num_programs(1) + i      # global block index

    @pl.when(i == 0)
    def _():
        acc_ref[...] = jnp.zeros_like(acc_ref)   # abs(err) >= 0 -> 0 is a valid init

    abserr = jnp.abs(x_ref[...].astype(jnp.float32) - y_ref[...].astype(jnp.float32))

    @pl.when(g < full_blocks)                    # fully-valid blocks: no mask VALU work
    def _():
        _fold_into_acc(acc_ref, abserr, acc_rows, jnp.maximum)

    @pl.when(g >= full_blocks)                   # ragged tail / phantom blocks only
    def _():
        valid = rows - g * block_rows            # may be <= 0 for phantom blocks
        ridx = lax.broadcasted_iota(jnp.int32, abserr.shape, 0)
        _fold_into_acc(acc_ref, jnp.where(ridx < valid, abserr, 0.0),
                       acc_rows, jnp.maximum)

    @pl.when(i == pl.num_programs(1) - 1)
    def _():
        o_ref[...] = jnp.zeros(o_ref.shape, jnp.float32) + jnp.max(acc_ref[...])


def _berhu_sum_kernel(m_ref, x_ref, y_ref, o_ref, acc_ref, *,
                      block_rows, acc_rows, rows, full_blocks, delta_frac):
    """Per-core sum of berHu losses; delta derived in-kernel from pass-1 partials."""
    c = pl.program_id(0)
    i = pl.program_id(1)
    g = c * pl.num_programs(1) + i

    @pl.when(i == 0)
    def _():
        acc_ref[...] = jnp.zeros_like(acc_ref)

    # Global max = max over both cores' (broadcast-filled) partial blocks.
    delta = jnp.float32(delta_frac) * jnp.max(m_ref[...])
    half_delta = jnp.float32(0.5) * delta
    half_inv_delta = jnp.where(delta > 0, jnp.float32(0.5) / delta, jnp.float32(0.0))

    err = x_ref[...].astype(jnp.float32) - y_ref[...].astype(jnp.float32)
    abserr = jnp.abs(err)
    quad = (half_inv_delta * err) * err + half_delta
    losses = jnp.where(abserr <= delta, abserr, quad)

    @pl.when(g < full_blocks)
    def _():
        _fold_into_acc(acc_ref, losses, acc_rows, jnp.add)

    @pl.when(g >= full_blocks)
    def _():
        valid = rows - g * block_rows
        ridx = lax.broadcasted_iota(jnp.int32, losses.shape, 0)
        _fold_into_acc(acc_ref, jnp.where(ridx < valid, losses, 0.0),
                       acc_rows, jnp.add)

    @pl.when(i == pl.num_programs(1) - 1)
    def _():
        o_ref[...] = jnp.zeros(o_ref.shape, jnp.float32) + jnp.sum(acc_ref[...])


# ---------------------------------------------------------------------------
# Wrappers.
# ---------------------------------------------------------------------------
def _berhu_fused(x2, y2, delta_frac):
    rows = x2.shape[0]
    tile_spec = pl.BlockSpec((rows, _LANES), lambda i: (0, 0))
    out = pl.pallas_call(
        functools.partial(_berhu_fused_kernel, delta_frac=delta_frac),
        out_shape=jax.ShapeDtypeStruct((8, _LANES), jnp.float32),
        grid=(1,),
        in_specs=[tile_spec, tile_spec],
        out_specs=pl.BlockSpec((8, _LANES), lambda i: (0, 0)),
        compiler_params=pltpu.CompilerParams(
            dimension_semantics=("arbitrary",),
            vmem_limit_bytes=_FUSED_VMEM_LIMIT),
    )(x2, y2)
    return out[0, 0]


def _berhu_two_pass(x2, y2, rows, delta_frac):
    itemsize = x2.dtype.itemsize
    cap = max(_TILE_BYTES // (_LANES * itemsize), 256)
    cap = (cap // 16) * 16                       # multiple of 16 sublanes (bf16 packing)
    block_rows = rows if rows <= cap else cap
    n_blocks = pl.cdiv(rows, block_rows)
    nbpc = pl.cdiv(n_blocks, _NUM_CORES)         # blocks per core (rectangular grid)
    full_blocks = rows // block_rows             # blocks with no ragged tail
    acc_rows = _ACC_ROWS if block_rows % _ACC_ROWS == 0 else block_rows

    def data_map(c, i):
        # Clamp phantom steps (odd block counts) onto the last real block; the
        # kernel masks their contribution to zero.
        return (jnp.minimum(c * nbpc + i, n_blocks - 1), 0)

    tile_spec = pl.BlockSpec((block_rows, _LANES), data_map)
    part_spec = pl.BlockSpec((1, 8, _LANES), lambda c, i: (c, 0, 0))
    part_shape = jax.ShapeDtypeStruct((_NUM_CORES, 8, _LANES), jnp.float32)
    acc_scratch = pltpu.VMEM((acc_rows, _LANES), jnp.float32)
    cparams = pltpu.CompilerParams(
        dimension_semantics=("parallel", "arbitrary"),
        vmem_limit_bytes=_STREAM_VMEM_LIMIT)
    kw = dict(block_rows=block_rows, acc_rows=acc_rows,
              rows=rows, full_blocks=full_blocks)

    # Pass 1: per-core max(|x - y|) partials.
    max_partials = pl.pallas_call(
        functools.partial(_max_abserr_kernel, **kw),
        out_shape=part_shape,
        grid=(_NUM_CORES, nbpc),
        in_specs=[tile_spec, tile_spec],
        out_specs=part_spec,
        scratch_shapes=[acc_scratch],
        compiler_params=cparams,
    )(x2, y2)

    # Pass 2: per-core loss sums (delta computed in-kernel from the partials).
    m_spec = pl.BlockSpec((_NUM_CORES, 8, _LANES), lambda c, i: (0, 0, 0))
    sum_partials = pl.pallas_call(
        functools.partial(_berhu_sum_kernel, delta_frac=delta_frac, **kw),
        out_shape=part_shape,
        grid=(_NUM_CORES, nbpc),
        in_specs=[m_spec, tile_spec, tile_spec],
        out_specs=part_spec,
        scratch_shapes=[acc_scratch],
        compiler_params=cparams,
    )(max_partials, x2, y2)

    return jnp.sum(sum_partials[:, 0, 0])


@functools.partial(jax.jit, static_argnames=("delta_frac", "force_two_pass"))
def berhu_loss(x: jax.Array, y: jax.Array, *, delta_frac: float = 0.1,
               force_two_pass: bool = False) -> jax.Array:
    """berHu loss. x, y: same shape (e.g. NCHW). Returns a float32 scalar."""
    n_elems = x.size
    xf = x.reshape(-1)
    yf = y.reshape(-1)

    # Only pad the (<128 element) lane tail to form a (rows, 128) slab; err == 0
    # there so it contributes nothing. No pad at all when size % 128 == 0.
    rem = n_elems % _LANES
    if rem:
        pad = _LANES - rem
        xf = jnp.pad(xf, (0, pad))
        yf = jnp.pad(yf, (0, pad))

    rows = xf.size // _LANES
    x2 = xf.reshape(rows, _LANES)
    y2 = yf.reshape(rows, _LANES)

    fused_ok = (2 * rows * _LANES * 4) <= _FUSED_MAX_F32_BYTES
    if fused_ok and not force_two_pass:
        loss_sum = _berhu_fused(x2, y2, delta_frac)
    else:
        loss_sum = _berhu_two_pass(x2, y2, rows, delta_frac)
    return loss_sum / jnp.float32(n_elems)


def _berhu_ref(x, y, delta_frac=0.1):
    err = x.astype(jnp.float32) - y.astype(jnp.float32)
    abserr = jnp.abs(err)
    delta = delta_frac * jnp.max(abserr)
    losses = jnp.where(abserr <= delta, abserr, 0.5 * (err ** 2 + delta ** 2) / delta)
    return jnp.mean(losses)


if __name__ == "__main__":
    key = jax.random.PRNGKey(0)
    k1, k2, k3, k4 = jax.random.split(key, 4)

    # Primary case: NCHW depth-map-like inputs (fused VMEM-resident path).
    x = jax.random.normal(k1, (2, 4, 16, 16), dtype=jnp.float32)
    y = jax.random.normal(k2, (2, 4, 16, 16), dtype=jnp.float32)
    out = jax.block_until_ready(berhu_loss(x, y, delta_frac=0.1))
    ref = _berhu_ref(x, y, 0.1)
    assert jnp.allclose(out, ref, rtol=1e-5, atol=1e-6), (out, ref)

    # Ragged size (not a multiple of 128): exercises the lane-tail pad.
    x2 = jax.random.normal(k3, (2, 3, 250, 99), dtype=jnp.float32)
    y2 = jax.random.normal(k4, (2, 3, 250, 99), dtype=jnp.float32)
    out2 = jax.block_until_ready(berhu_loss(x2, y2, delta_frac=0.1))
    ref2 = _berhu_ref(x2, y2, 0.1)
    assert jnp.allclose(out2, ref2, rtol=1e-5, atol=1e-6), (out2, ref2)

    # Same inputs through the two-pass streaming path (large-input code path,
    # dual-core grid, tail masking, small accumulator, in-kernel delta).
    out3 = jax.block_until_ready(berhu_loss(x2, y2, delta_frac=0.1, force_two_pass=True))
    assert jnp.allclose(out3, ref2, rtol=1e-5, atol=1e-6), (out3, ref2)

    # bf16 inputs through the streaming path (dtype-aware tiling / in-kernel upcast).
    xb = x.astype(jnp.bfloat16)
    yb = y.astype(jnp.bfloat16)
    out4 = jax.block_until_ready(berhu_loss(xb, yb, delta_frac=0.1, force_two_pass=True))
    ref4 = _berhu_ref(xb, yb, 0.1)
    assert jnp.allclose(out4, ref4, rtol=1e-4, atol=1e-5), (out4, ref4)

    print("KERNEL_OK")
</pallas_src>

<mosaic_0001>
module attributes {stable_mosaic.version = 11 : i64} {
  func.func @_berhu_fused_kernel(%arg0: i32, %arg1: memref<16x128xf32, #tpu.memory_space<vmem>>, %arg2: memref<16x128xf32, #tpu.memory_space<vmem>>, %arg3: memref<8x128xf32, #tpu.memory_space<vmem>>) attributes {dimension_semantics = [#tpu.dimension_semantics<arbitrary>], iteration_bounds = array<i64: 1>, scalar_prefetch = 0 : i64, scratch_operands = 0 : i64, tpu.core_type = #tpu.core_type<tc>, window_params = [{pipeline_mode = #tpu.pipeline_mode<synchronous>, transform_indices = @transform_0, window_bounds = array<i64: 16, 128>}, {pipeline_mode = #tpu.pipeline_mode<synchronous>, transform_indices = @transform_1, window_bounds = array<i64: 16, 128>}, {pipeline_mode = #tpu.pipeline_mode<synchronous>, transform_indices = @transform_2, window_bounds = array<i64: 8, 128>}]} {
    %c0 = arith.constant 0 : index
    %c0_0 = arith.constant 0 : index
    %0 = vector.load %arg1[%c0, %c0_0] : memref<16x128xf32, #tpu.memory_space<vmem>>, vector<16x128xf32>
    %c0_1 = arith.constant 0 : index
    %c0_2 = arith.constant 0 : index
    %1 = vector.load %arg2[%c0_1, %c0_2] : memref<16x128xf32, #tpu.memory_space<vmem>>, vector<16x128xf32>
    %2 = arith.subf %0, %1 : vector<16x128xf32>
    %3 = math.absf %2 : vector<16x128xf32>
    %4 = vector.shape_cast %3 : vector<16x128xf32> to vector<1x16x128xf32>
    %cst = arith.constant dense<0xFF800000> : vector<1xf32>
    %5 = vector.multi_reduction <maximumf>, %4, %cst [1, 2] : vector<1x16x128xf32> to vector<1xf32>
    %6 = vector.shape_cast %5 : vector<1xf32> to vector<1x1x1xf32>
    %7 = vector.extract %6[0, 0, 0] : f32 from vector<1x1x1xf32>
    %cst_3 = arith.constant 1.000000e-01 : f32
    %8 = arith.mulf %cst_3, %7 : f32
    %cst_4 = arith.constant 5.000000e-01 : f32
    %9 = arith.mulf %cst_4, %8 : f32
    %cst_5 = arith.constant 0.000000e+00 : f32
    %10 = arith.cmpf ogt, %8, %cst_5 : f32
    %cst_6 = arith.constant 5.000000e-01 : f32
    %11 = arith.divf %cst_6, %8 : f32
    %cst_7 = arith.constant 0.000000e+00 : f32
    %12 = arith.select %10, %11, %cst_7 : f32
    %13 = vector.broadcast %12 : f32 to vector<16x128xf32>
    %14 = arith.mulf %13, %2 : vector<16x128xf32>
    %15 = arith.mulf %14, %2 : vector<16x128xf32>
    %16 = vector.broadcast %9 : f32 to vector<16x128xf32>
    %17 = arith.addf %15, %16 : vector<16x128xf32>
    %18 = vector.broadcast %8 : f32 to vector<16x128xf32>
    %19 = arith.cmpf ole, %3, %18 : vector<16x128xf32>
    %20 = arith.select %19, %3, %17 : vector<16x128xi1>, vector<16x128xf32>
    %cst_8 = arith.constant 0.000000e+00 : f32
    %21 = vector.broadcast %cst_8 : f32 to vector<8x128xf32>
    %22 = vector.shape_cast %20 : vector<16x128xf32> to vector<1x16x128xf32>
    %cst_9 = arith.constant dense<0.000000e+00> : vector<1xf32>
    %23 = vector.multi_reduction <add>, %22, %cst_9 [1, 2] : vector<1x16x128xf32> to vector<1xf32>
    %24 = vector.shape_cast %23 : vector<1xf32> to vector<1x1x1xf32>
    %25 = vector.extract %24[0, 0, 0] : f32 from vector<1x1x1xf32>
    %26 = vector.broadcast %25 : f32 to vector<8x128xf32>
    %27 = arith.addf %21, %26 : vector<8x128xf32>
    %c0_10 = arith.constant 0 : index
    %c0_11 = arith.constant 0 : index
    %28 = vector.load %arg3[%c0_10, %c0_11] : memref<8x128xf32, #tpu.memory_space<vmem>>, vector<8x128xf32>
    tpu.vector_store %arg3[%c0_10, %c0_11], %27 {strides = array<i32>} : memref<8x128xf32, #tpu.memory_space<vmem>>, vector<8x128xf32>,
    return
  }
  func.func @transform_0(%arg0: i32) -> (i32, i32) {
    %c0_i32 = arith.constant 0 : i32
    %c0_i32_0 = arith.constant 0 : i32
    %c0_i32_1 = arith.constant 0 : i32
    return %c0_i32, %c0_i32_0 : i32, i32
  }
  func.func @transform_1(%arg0: i32) -> (i32, i32) {
    %c0_i32 = arith.constant 0 : i32
    %c0_i32_0 = arith.constant 0 : i32
    %c0_i32_1 = arith.constant 0 : i32
    return %c0_i32, %c0_i32_0 : i32, i32
  }
  func.func @transform_2(%arg0: i32) -> (i32, i32) {
    %c0_i32 = arith.constant 0 : i32
    %c0_i32_0 = arith.constant 0 : i32
    %c0_i32_1 = arith.constant 0 : i32
    return %c0_i32, %c0_i32_0 : i32, i32
  }
}

</mosaic_0001>

<bundles_post_ra>
// kernel: berhu_loss.1
= control target key start
LH: loop header
LB: loop body
LE: loop exit
PB: predicated region body
PF: predicated region fallthrough
CT: control target
= control target key end

     0   :  { %s118_s0 = inlined_call_operand.vmem [shape: f32[16,128], index: 0, kind: input, shape index: {}]   ;;  %s119_s1 = inlined_call_operand.vmem [shape: f32[16,128], index: 1, kind: input, shape index: {}]   ;;  %s120_s2 = inlined_call_operand.vmem [shape: f32[8,128], index: 2, kind: output, shape index: {}]  }
   0x1   :  { %v11_v0 = vld [vmem:[%s118_s0] sm:$0xff]  ;;  %v12_v1 = vld [vmem:[%s118_s0 + $0x8] sm:$0xff] }
   0x2   :  { %v13_v2 = vld [vmem:[%s119_s1] sm:$0xff]  ;;  %v14_v3 = vld [vmem:[%s119_s1 + $0x8] sm:$0xff] }
   0x3   :  { %v15_v4 = vsub.f32 %v11_v0, %v13_v2  ;;  %v16_v5 = vsub.f32 %v12_v1, %v14_v3 }
   0x5   :  { %v17_v6 = vand.u32 2147483647, %v15_v4  ;;  %v18_v7 = vand.u32 2147483647, %v16_v5 }
   0x7   :  { %v19_v8 = vmax.f32 %v17_v6, %v18_v7 }
   0x9   :  { %20 = vmax.xlane.f32.xlu0 %v19_v8 }
  0x7c   :  { %v21_v9 = vpop.xlane.xlu0 %20 }
  0x7d   :  { %v22_v10 = vrot.slane %v21_v9, 4 }
  0x7f   :  { %v23_v11 = vmax.f32 %v21_v9, %v22_v10 }
  0x81   :  { %v24_v12 = vrot.slane %v23_v11, 2 }
  0x83   :  { %v25_v13 = vmax.f32 %v23_v11, %v24_v12 }
  0x85   :  { %v26_v14 = vrot.slane %v25_v13, 1 }
  0x87   :  { %v27_v15 = vmax.f32 %v25_v13, %v26_v14 }
  0x89   :  { %80 = vpush %v27_v15 }
  0xba   :  { %s81_s0 = spop %80 }
  0xbb   :  { %s29_s17 = smul.f32 0.1, %s81_s0 }
  0xbd   :  { %v32_v16 = vstv %s29_s17  ;;  %p31_p0 = scmp.gt.f32.partialorder %s29_s17, 0.0  ;;  %s30_s19 = smul.f32 0.5, %s29_s17 }
  0xbe   :  { %86 = vrcp.f32 %v32_v16  ;;  %v44_v20 = vand.u32 2147483648, %v32_v16  ;;  %v42_v22 = vand.u32 2147483647, %v32_v16  ;;  %vm38_vm1 = vweird.f32 %v32_v16 }
  0xbf   :  { %v55_v32 = vstv %s30_s19  ;;  %vm59_vm4 = vcmp.le.f32.partialorder %v17_v6, %v32_v16  ;;  %vm60_vm5 = vcmp.le.f32.partialorder %v18_v7, %v32_v16 }
  0xc0   :  { %v45_v24 = vor.u32 1.1754944e-38, %v44_v20  ;;  %vm43_vm3 = vcmp.eq.f32.partialorder %v42_v22, 8.507059e+37 }
  0xc4   :  { %v87_v17 = vpop.eup %86 }
  0xc5   :  { %v34_v18 = vmul.f32 %v87_v17, %v32_v16  ;;  %vm39_vm0 = vweird.f32 %v87_v17 }
  0xc6   :  { %vm40_vm2 = vmor %vm38_vm1, %vm39_vm0 }
  0xc7   :  { %v35_v19 = vsub.f32 1.0, %v34_v18 }
  0xc9   :  { %v36_v21 = vmul.f32 %v87_v17, %v35_v19 }
  0xcb   :  { %v37_v23 = vadd.f32 %v87_v17, %v36_v21 }
  0xcd   :  { %v41_v25 = vsel %vm40_vm2, %v87_v17, %v37_v23 }
  0xce   :  { %v46_v26 = vsel %vm43_vm3, %v45_v24, %v41_v25 }
  0xcf   :  { %82 = vpush %v46_v26 }
 0x100   :  { %s83_s1 = spop %82 }
 0x101   :  { %s48_s18 = smul.f32 0.5, %s83_s1 }
 0x103   :  { %s122_s18 = smov (!%p31_p0, %s48_s18), 0.0 }
 0x104   :  { %v50_v27 = vstv %s122_s18 }
 0x105   :  { %v51_v28 = vmul.f32 %v50_v27, %v15_v4  ;;  %v52_v29 = vmul.f32 %v50_v27, %v16_v5 }
 0x107   :  { %v53_v30 = vmul.f32 %v51_v28, %v15_v4  ;;  %v54_v31 = vmul.f32 %v52_v29, %v16_v5 }
 0x109   :  { %v56_v33 = vadd.f32 %v55_v32, %v53_v30  ;;  %v57_v34 = vadd.f32 %v55_v32, %v54_v31 }
 0x10b   :  { %v61_v35 = vsel %vm59_vm4, %v17_v6, %v56_v33  ;;  %v62_v36 = vsel %vm60_vm5, %v18_v7, %v57_v34 }
 0x10c   :  { %v63_v37 = vadd.f32 %v62_v36, %v61_v35 }
 0x10e   :  { %64 = vadd.xlane.f32.xlu0 %v63_v37 }
 0x181   :  { %v65_v38 = vpop.xlane.xlu0 %64 }
 0x182   :  { %v66_v39 = vrot.slane %v65_v38, 4 }
 0x184   :  { %v67_v40 = vadd.f32 %v66_v39, %v65_v38 }
 0x186   :  { %v68_v41 = vrot.slane %v67_v40, 2 }
 0x188   :  { %v69_v42 = vadd.f32 %v68_v41, %v67_v40 }
 0x18a   :  { %v70_v43 = vrot.slane %v69_v42, 1 }
 0x18c   :  { %v71_v44 = vadd.f32 %v70_v43, %v69_v42 }
 0x18e   :  { %84 = vpush %v71_v44 }
 0x1bf   :  { %s85_s20 = spop %84 }
 0x1c0   :  { %v73_v45 = vstv %s85_s20 }
 0x1c1   :  { %75 = vst [vmem:[%s120_s2] sm:$0xff] %v73_v45 }

</bundles_post_ra>
